<compile_context>
chip_gen: v6e
topology: v6e:2x2x1
jax: 0.10.0
libtpu: 0.0.40
codegen_flags: <defaults>
</compile_context>

<pallas_src>
import jax
import jax.numpy as jnp
from jax.experimental import pallas as pl
from jax.experimental.pallas import tpu as pltpu

EPS = 1e-5  # nn.BatchNorm2d default


# ------------------------------ kernel ------------------------------

def _make_kernel(N, H, W, D, Cout):
    NH = N * H
    WD = W * D
    WCout = W * Cout

    def kernel(x_ref, bd1_ref, t2_ref, bd3_ref, bds_ref,
               red_ref, bc_ref, gb_ref, o_ref):
        # Packed BN reduce / broadcast matrices (1/count folded into `red`).
        # Both packs are ordered so every row-slice start is 8-aligned.
        rO = red_ref[0:WCout, :]                  # (W*Cout, Cout)
        rD = red_ref[WCout:WCout + WD, 0:D]       # (W*D, D)
        bO = bc_ref[0:Cout, :]                    # (Cout, W*Cout)
        bD = bc_ref[Cout:Cout + D, 0:WD]          # (D, W*D)
        # Packed per-channel gamma/beta vectors.
        g1 = gb_ref[0:1, 0:D]
        b1 = gb_ref[1:2, 0:D]
        g2 = gb_ref[2:3, 0:D]
        b2 = gb_ref[3:4, 0:D]
        gs = gb_ref[4:5, :]
        bs = gb_ref[5:6, :]

        def bn(y, red, bcast, gamma, beta):
            """Training-mode BN on a (rows, W*C) slab via factored reduce/broadcast."""
            s = jnp.sum(y, axis=0, keepdims=True)            # (1, W*C)
            ss = jnp.sum(y * y, axis=0, keepdims=True)       # single-pass stats
            stats = jnp.dot(jnp.concatenate([s, ss], axis=0), red,
                            preferred_element_type=jnp.float32)   # (2, C): [mean; E[y^2]]
            mean = stats[0:1]
            var = stats[1:2] - mean * mean                   # biased variance
            scale = gamma * jax.lax.rsqrt(var + EPS)         # (1, C), EUP rsqrt
            shift = beta - mean * scale                      # (1, C)
            lane = jnp.dot(jnp.concatenate([scale, shift], axis=0), bcast,
                           preferred_element_type=jnp.float32)    # (2, W*C)
            return y * lane[0:1] + lane[1:2]

        # Cast x to bf16 ONCE; reused by conv1 and the shortcut matmul.
        x_bf = x_ref[...].astype(jnp.bfloat16)               # (N*H, W*Cin)

        # ---- left branch, conv1: 1x1 (Cin -> D) + BN + ReLU ----
        y1 = jnp.dot(x_bf, bd1_ref[...], preferred_element_type=jnp.float32)
        a1 = jnp.maximum(bn(y1, rD, bD, g1, b1), 0.0)
        a1_bf = a1.astype(jnp.bfloat16)                      # cast once for all 3 taps

        # ---- left branch, conv2: 3x3 (D -> D, pad 1, stride 1) ----
        # dx taps + W padding live inside t2[dy]; dy shift + H padding are applied
        # with exact 0/1 row-shift matrices built from iota (each output row selects
        # at most one input row, so these dots are exact).
        p0 = jnp.dot(a1_bf, t2_ref[0], preferred_element_type=jnp.float32)
        p1 = jnp.dot(a1_bf, t2_ref[1], preferred_element_type=jnp.float32)
        p2 = jnp.dot(a1_bf, t2_ref[2], preferred_element_type=jnp.float32)
        row = jax.lax.broadcasted_iota(jnp.int32, (NH, NH), 0)
        col = jax.lax.broadcasted_iota(jnp.int32, (NH, NH), 1)
        top_sel = ((col == row - 1) & (row % H != 0)).astype(jnp.float32)
        bot_sel = ((col == row + 1) & (row % H != H - 1)).astype(jnp.float32)
        acc2 = (p1
                + jnp.dot(top_sel, p0, preferred_element_type=jnp.float32)
                + jnp.dot(bot_sel, p2, preferred_element_type=jnp.float32))
        a2 = jnp.maximum(bn(acc2, rD, bD, g2, b2), 0.0)

        # ---- left branch, conv3: 1x1 (D -> Cout); no BN / ReLU before the add ----
        left = jnp.dot(a2.astype(jnp.bfloat16), bd3_ref[...],
                       preferred_element_type=jnp.float32)   # (N*H, W*Cout)

        # ---- shortcut: 1x1 (Cin -> Cout) + BN (conv bias dropped: no-op pre-BN) ----
        short = bn(jnp.dot(x_bf, bds_ref[...], preferred_element_type=jnp.float32),
                   rO, bO, gs, bs)

        # ---- residual add + final ReLU; (N*H, 128) store is fully lane-dense ----
        o_ref[...] = jnp.maximum(left + short, 0.0)

    return kernel


# ------------------- wrapper-side weight re-layouts (run ONCE) -------------------

def _block_diag_1x1(wk, W):
    """(Ci, Co) 1x1-conv weight -> (W*Ci, W*Co) block-diagonal for the slab layout."""
    eye = jnp.eye(W, dtype=jnp.float32)
    ci, co = wk.shape
    return jnp.einsum("uv,io->uivo", eye, wk.astype(jnp.float32)).reshape(W * ci, W * co)


def _toeplitz_3x3(w_hwio, W):
    """(3,3,Ci,Co) conv weight -> (3, W*Ci, W*Co); each dy folds all dx taps and the
    W-direction zero padding into one banded matrix acting on the lane axis."""
    ci, co = w_hwio.shape[2], w_hwio.shape[3]
    idx = jnp.arange(W)
    mats = []
    for dy in range(3):
        t = jnp.zeros((W * ci, W * co), jnp.float32)
        for dx in range(3):
            sel = (idx[:, None] == idx[None, :] + (dx - 1)).astype(jnp.float32)
            t = t + jnp.einsum("uv,io->uivo", sel,
                               w_hwio[dy, dx].astype(jnp.float32)).reshape(W * ci, W * co)
        mats.append(t)
    return jnp.stack(mats, axis=0)


def _reduce_matrix(C, W, count):
    """(W*C, C): sums lanes w*C+c over w into channel c, scaled by 1/count."""
    return jnp.tile(jnp.eye(C, dtype=jnp.float32), (W, 1)) / float(count)


def _broadcast_matrix(C, W):
    """(C, W*C): broadcasts a per-channel row vector back to the w*C+c lane layout."""
    return jnp.tile(jnp.eye(C, dtype=jnp.float32), (1, W))


def prepare_params(params, N, H, W):
    """One-time re-layout of module parameters into kernel-ready device arrays."""
    D = params["w2"].shape[-1]
    Cout = params["w3"].shape[-1]
    WD, WCout = W * D, W * Cout
    count = N * H * W

    red = jnp.zeros((WCout + WD, Cout), jnp.float32)
    red = red.at[0:WCout, :].set(_reduce_matrix(Cout, W, count))
    red = red.at[WCout:, 0:D].set(_reduce_matrix(D, W, count))

    bc = jnp.zeros((Cout + D, WCout), jnp.float32)
    bc = bc.at[0:Cout, :].set(_broadcast_matrix(Cout, W))
    bc = bc.at[Cout:, 0:WD].set(_broadcast_matrix(D, W))

    gb = jnp.zeros((6, Cout), jnp.float32)
    gb = gb.at[0, 0:D].set(jnp.asarray(params["g1"], jnp.float32))
    gb = gb.at[1, 0:D].set(jnp.asarray(params["b1"], jnp.float32))
    gb = gb.at[2, 0:D].set(jnp.asarray(params["g2"], jnp.float32))
    gb = gb.at[3, 0:D].set(jnp.asarray(params["b2"], jnp.float32))
    gb = gb.at[4, :].set(jnp.asarray(params["gs"], jnp.float32))
    gb = gb.at[5, :].set(jnp.asarray(params["bs"], jnp.float32))

    # NOTE: params["ws_b"] is intentionally dropped — a per-channel bias added
    # before training-mode BN cancels exactly (mean shift, variance unchanged).
    return {
        "bd1": _block_diag_1x1(params["w1"][0, 0], W).astype(jnp.bfloat16),
        "t2":  _toeplitz_3x3(params["w2"], W).astype(jnp.bfloat16),
        "bd3": _block_diag_1x1(params["w3"][0, 0], W).astype(jnp.bfloat16),
        "bds": _block_diag_1x1(params["ws"][0, 0], W).astype(jnp.bfloat16),
        "red": red,
        "bc":  bc,
        "gb":  gb,
    }


@jax.jit
def bottleneck_forward(x_nchw, prep):
    """Fused BottleNeck forward. x_nchw: (N, Cin, H, W) f32 -> (N, Cout, H, W) f32."""
    x = jnp.transpose(x_nchw, (0, 2, 3, 1)).astype(jnp.float32)   # NCHW -> NHWC
    N, H, W, Cin = x.shape
    WD = prep["t2"].shape[-1]
    WCout = prep["bd3"].shape[-1]
    D, Cout = WD // W, WCout // W
    NH = N * H

    x_slab = x.reshape(NH, W * Cin)                               # (n,h) rows, (w,c) lanes
    vmem = pl.BlockSpec(memory_space=pltpu.MemorySpace.VMEM)
    out_slab = pl.pallas_call(
        _make_kernel(N, H, W, D, Cout),
        out_shape=jax.ShapeDtypeStruct((NH, WCout), jnp.float32),
        in_specs=[vmem] * 8,
        out_specs=vmem,
    )(x_slab, prep["bd1"], prep["t2"], prep["bd3"], prep["bds"],
      prep["red"], prep["bc"], prep["gb"])

    out = out_slab.reshape(N, H, W, Cout)
    return jnp.transpose(out, (0, 3, 1, 2))                       # NHWC -> NCHW


# ------------------------------ pure-JAX reference ------------------------------

def bottleneck_reference(x_nchw, params):
    """lax.conv f32 reference with identical training-mode BN semantics (keeps the
    shortcut conv bias, which the kernel provably drops as a no-op)."""
    x = jnp.transpose(x_nchw, (0, 2, 3, 1)).astype(jnp.float32)
    dn = ("NHWC", "HWIO", "NHWC")
    hp = jax.lax.Precision.HIGHEST

    def bn(y, g, b):
        m = jnp.mean(y, axis=(0, 1, 2), keepdims=True)
        v = jnp.mean(jnp.square(y - m), axis=(0, 1, 2), keepdims=True)
        return (y - m) * jax.lax.rsqrt(v + EPS) * g.reshape(1, 1, 1, -1) + b.reshape(1, 1, 1, -1)

    y = jax.lax.conv_general_dilated(x, params["w1"], (1, 1), ((0, 0), (0, 0)),
                                     dimension_numbers=dn, precision=hp)
    y = jnp.maximum(bn(y, params["g1"], params["b1"]), 0.0)
    y = jax.lax.conv_general_dilated(y, params["w2"], (1, 1), ((1, 1), (1, 1)),
                                     dimension_numbers=dn, precision=hp)
    y = jnp.maximum(bn(y, params["g2"], params["b2"]), 0.0)
    y = jax.lax.conv_general_dilated(y, params["w3"], (1, 1), ((0, 0), (0, 0)),
                                     dimension_numbers=dn, precision=hp)
    s = jax.lax.conv_general_dilated(x, params["ws"], (1, 1), ((0, 0), (0, 0)),
                                     dimension_numbers=dn, precision=hp)
    s = bn(s + params["ws_b"].reshape(1, 1, 1, -1), params["gs"], params["bs"])
    out = jnp.maximum(y + s, 0.0)
    return jnp.transpose(out, (0, 3, 1, 2))


if __name__ == "__main__":
    # BottleNeck(input_channel=4, out_channel=8, stride=1): down_sample = 8 // 4 = 2,
    # Cin != Cout -> shortcut = 1x1 conv(bias=True) + BN.
    N, Cin, Cout, H, W = 2, 4, 8, 16, 16
    D = Cout // 4
    key = jax.random.PRNGKey(0)
    ks = jax.random.split(key, 12)

    params = {
        # conv weights stored HWIO (PyTorch OIHW transposed)
        "w1": 0.3 * jax.random.normal(ks[0], (1, 1, Cin, D), jnp.float32),
        "g1": 1.0 + 0.1 * jax.random.normal(ks[1], (D,), jnp.float32),
        "b1": 0.1 * jax.random.normal(ks[2], (D,), jnp.float32),
        "w2": 0.3 * jax.random.normal(ks[3], (3, 3, D, D), jnp.float32),
        "g2": 1.0 + 0.1 * jax.random.normal(ks[4], (D,), jnp.float32),
        "b2": 0.1 * jax.random.normal(ks[5], (D,), jnp.float32),
        "w3": 0.3 * jax.random.normal(ks[6], (1, 1, D, Cout), jnp.float32),
        "ws": 0.3 * jax.random.normal(ks[7], (1, 1, Cin, Cout), jnp.float32),
        "ws_b": 0.1 * jax.random.normal(ks[8], (Cout,), jnp.float32),
        "gs": 1.0 + 0.1 * jax.random.normal(ks[9], (Cout,), jnp.float32),
        "bs": 0.1 * jax.random.normal(ks[10], (Cout,), jnp.float32),
    }
    x = jax.random.normal(ks[11], (N, Cin, H, W), jnp.float32)

    prep = prepare_params(params, N, H, W)        # one-time weight re-layout / cast
    prep = jax.tree_util.tree_map(jax.block_until_ready, prep)

    out = jax.block_until_ready(bottleneck_forward(x, prep))
    ref = jax.block_until_ready(bottleneck_reference(x, params))

    assert out.shape == (N, Cout, H, W), out.shape
    max_err = float(jnp.max(jnp.abs(out - ref)))
    if not bool(jnp.allclose(out, ref, rtol=2e-2, atol=2e-2)):
        raise SystemExit(f"mismatch vs reference: max abs err = {max_err}")
    print("KERNEL_OK")
</pallas_src>

<mosaic_0001>
module attributes {stable_mosaic.version = 11 : i64} {
  func.func @kernel(%arg0: memref<32x64xf32, #tpu.memory_space<vmem>>, %arg1: memref<64x32xbf16, #tpu.memory_space<vmem>>, %arg2: memref<3x32x32xbf16, #tpu.memory_space<vmem>>, %arg3: memref<32x128xbf16, #tpu.memory_space<vmem>>, %arg4: memref<64x128xbf16, #tpu.memory_space<vmem>>, %arg5: memref<160x8xf32, #tpu.memory_space<vmem>>, %arg6: memref<10x128xf32, #tpu.memory_space<vmem>>, %arg7: memref<6x8xf32, #tpu.memory_space<vmem>>, %arg8: memref<32x128xf32, #tpu.memory_space<vmem>>) attributes {dimension_semantics = [], scalar_prefetch = 0 : i64, scratch_operands = 0 : i64, tpu.core_type = #tpu.core_type<tc>} {
    %c0 = arith.constant 0 : index
    %c0_0 = arith.constant 0 : index
    %0 = vector.load %arg5[%c0, %c0_0] : memref<160x8xf32, #tpu.memory_space<vmem>>, vector<128x8xf32>
    %c128 = arith.constant 128 : index
    %c0_1 = arith.constant 0 : index
    %1 = vector.load %arg5[%c128, %c0_1] : memref<160x8xf32, #tpu.memory_space<vmem>>, vector<32x2xf32>
    %c0_2 = arith.constant 0 : index
    %c0_3 = arith.constant 0 : index
    %2 = vector.load %arg6[%c0_2, %c0_3] : memref<10x128xf32, #tpu.memory_space<vmem>>, vector<8x128xf32>
    %c8 = arith.constant 8 : index
    %c0_4 = arith.constant 0 : index
    %3 = vector.load %arg6[%c8, %c0_4] : memref<10x128xf32, #tpu.memory_space<vmem>>, vector<2x32xf32>
    %c0_5 = arith.constant 0 : index
    %c0_6 = arith.constant 0 : index
    %4 = vector.load %arg7[%c0_5, %c0_6] : memref<6x8xf32, #tpu.memory_space<vmem>>, vector<1x2xf32>
    %c1 = arith.constant 1 : index
    %c0_7 = arith.constant 0 : index
    %5 = vector.load %arg7[%c1, %c0_7] : memref<6x8xf32, #tpu.memory_space<vmem>>, vector<1x2xf32>
    %c2 = arith.constant 2 : index
    %c0_8 = arith.constant 0 : index
    %6 = vector.load %arg7[%c2, %c0_8] : memref<6x8xf32, #tpu.memory_space<vmem>>, vector<1x2xf32>
    %c3 = arith.constant 3 : index
    %c0_9 = arith.constant 0 : index
    %7 = vector.load %arg7[%c3, %c0_9] : memref<6x8xf32, #tpu.memory_space<vmem>>, vector<1x2xf32>
    %c4 = arith.constant 4 : index
    %c0_10 = arith.constant 0 : index
    %8 = vector.load %arg7[%c4, %c0_10] : memref<6x8xf32, #tpu.memory_space<vmem>>, vector<1x8xf32>
    %c5 = arith.constant 5 : index
    %c0_11 = arith.constant 0 : index
    %9 = vector.load %arg7[%c5, %c0_11] : memref<6x8xf32, #tpu.memory_space<vmem>>, vector<1x8xf32>
    %c0_12 = arith.constant 0 : index
    %c0_13 = arith.constant 0 : index
    %10 = vector.load %arg0[%c0_12, %c0_13] : memref<32x64xf32, #tpu.memory_space<vmem>>, vector<32x64xf32>
    %11 = arith.truncf %10 : vector<32x64xf32> to vector<32x64xbf16>
    %c0_14 = arith.constant 0 : index
    %c0_15 = arith.constant 0 : index
    %12 = vector.load %arg1[%c0_14, %c0_15] : memref<64x32xbf16, #tpu.memory_space<vmem>>, vector<64x32xbf16>
    %cst = arith.constant dense<0.000000e+00> : vector<32x32xf32>
    %13 = tpu.matmul %11, %12, %cst {dimension_numbers = #tpu.dot_dimension_numbers<[1], [0], [0], [1], [0, 0, 1, 1], [], []>} : vector<32x64xbf16>, vector<64x32xbf16>, vector<32x32xf32> -> vector<32x32xf32>
    %cst_16 = arith.constant dense<0.000000e+00> : vector<32xf32>
    %14 = vector.multi_reduction <add>, %13, %cst_16 [0] : vector<32x32xf32> to vector<32xf32>
    %15 = vector.shape_cast %14 : vector<32xf32> to vector<1x32xf32>
    %16 = arith.mulf %13, %13 : vector<32x32xf32>
    %cst_17 = arith.constant dense<0.000000e+00> : vector<32xf32>
    %17 = vector.multi_reduction <add>, %16, %cst_17 [0] : vector<32x32xf32> to vector<32xf32>
    %18 = vector.shape_cast %17 : vector<32xf32> to vector<1x32xf32>
    %19 = tpu.concatenate %15, %18 in 0 : vector<1x32xf32>, vector<1x32xf32> -> vector<2x32xf32>
    %cst_18 = arith.constant dense<0.000000e+00> : vector<2x2xf32>
    %20 = tpu.matmul %19, %1, %cst_18 {dimension_numbers = #tpu.dot_dimension_numbers<[1], [0], [0], [1], [0, 0, 1, 1], [], []>} : vector<2x32xf32>, vector<32x2xf32>, vector<2x2xf32> -> vector<2x2xf32>
    %21 = vector.extract_strided_slice %20 {offsets = [0, 0], sizes = [1, 2], strides = [1, 1]} : vector<2x2xf32> to vector<1x2xf32>
    %22 = vector.extract_strided_slice %20 {offsets = [1, 0], sizes = [1, 2], strides = [1, 1]} : vector<2x2xf32> to vector<1x2xf32>
    %23 = arith.mulf %21, %21 : vector<1x2xf32>
    %24 = arith.subf %22, %23 : vector<1x2xf32>
    %cst_19 = arith.constant 9.99999974E-6 : f32
    %25 = vector.broadcast %cst_19 : f32 to vector<1x2xf32>
    %26 = arith.addf %24, %25 : vector<1x2xf32>
    %27 = math.rsqrt %26 : vector<1x2xf32>
    %28 = arith.mulf %4, %27 : vector<1x2xf32>
    %29 = arith.mulf %21, %28 : vector<1x2xf32>
    %30 = arith.subf %5, %29 : vector<1x2xf32>
    %31 = tpu.concatenate %28, %30 in 0 : vector<1x2xf32>, vector<1x2xf32> -> vector<2x2xf32>
    %cst_20 = arith.constant dense<0.000000e+00> : vector<2x32xf32>
    %32 = tpu.matmul %31, %3, %cst_20 {dimension_numbers = #tpu.dot_dimension_numbers<[1], [0], [0], [1], [0, 0, 1, 1], [], []>} : vector<2x2xf32>, vector<2x32xf32>, vector<2x32xf32> -> vector<2x32xf32>
    %33 = vector.extract_strided_slice %32 {offsets = [0, 0], sizes = [1, 32], strides = [1, 1]} : vector<2x32xf32> to vector<1x32xf32>
    %34 = vector.broadcast %33 : vector<1x32xf32> to vector<32x32xf32>
    %35 = arith.mulf %13, %34 : vector<32x32xf32>
    %36 = vector.extract_strided_slice %32 {offsets = [1, 0], sizes = [1, 32], strides = [1, 1]} : vector<2x32xf32> to vector<1x32xf32>
    %37 = vector.broadcast %36 : vector<1x32xf32> to vector<32x32xf32>
    %38 = arith.addf %35, %37 : vector<32x32xf32>
    %cst_21 = arith.constant 0.000000e+00 : f32
    %39 = vector.broadcast %cst_21 : f32 to vector<32x32xf32>
    %40 = arith.maximumf %38, %39 : vector<32x32xf32>
    %41 = arith.truncf %40 : vector<32x32xf32> to vector<32x32xbf16>
    %c0_22 = arith.constant 0 : index
    %c0_23 = arith.constant 0 : index
    %c0_24 = arith.constant 0 : index
    %42 = vector.load %arg2[%c0_22, %c0_23, %c0_24] : memref<3x32x32xbf16, #tpu.memory_space<vmem>>, vector<1x32x32xbf16>
    %43 = vector.shape_cast %42 : vector<1x32x32xbf16> to vector<32x32xbf16>
    %cst_25 = arith.constant dense<0.000000e+00> : vector<32x32xf32>
    %44 = tpu.matmul %41, %43, %cst_25 {dimension_numbers = #tpu.dot_dimension_numbers<[1], [0], [0], [1], [0, 0, 1, 1], [], []>} : vector<32x32xbf16>, vector<32x32xbf16>, vector<32x32xf32> -> vector<32x32xf32>
    %c1_26 = arith.constant 1 : index
    %c0_27 = arith.constant 0 : index
    %c0_28 = arith.constant 0 : index
    %45 = vector.load %arg2[%c1_26, %c0_27, %c0_28] : memref<3x32x32xbf16, #tpu.memory_space<vmem>>, vector<1x32x32xbf16>
    %46 = vector.shape_cast %45 : vector<1x32x32xbf16> to vector<32x32xbf16>
    %cst_29 = arith.constant dense<0.000000e+00> : vector<32x32xf32>
    %47 = tpu.matmul %41, %46, %cst_29 {dimension_numbers = #tpu.dot_dimension_numbers<[1], [0], [0], [1], [0, 0, 1, 1], [], []>} : vector<32x32xbf16>, vector<32x32xbf16>, vector<32x32xf32> -> vector<32x32xf32>
    %c2_30 = arith.constant 2 : index
    %c0_31 = arith.constant 0 : index
    %c0_32 = arith.constant 0 : index
    %48 = vector.load %arg2[%c2_30, %c0_31, %c0_32] : memref<3x32x32xbf16, #tpu.memory_space<vmem>>, vector<1x32x32xbf16>
    %49 = vector.shape_cast %48 : vector<1x32x32xbf16> to vector<32x32xbf16>
    %cst_33 = arith.constant dense<0.000000e+00> : vector<32x32xf32>
    %50 = tpu.matmul %41, %49, %cst_33 {dimension_numbers = #tpu.dot_dimension_numbers<[1], [0], [0], [1], [0, 0, 1, 1], [], []>} : vector<32x32xbf16>, vector<32x32xbf16>, vector<32x32xf32> -> vector<32x32xf32>
    %51 = tpu.iota {dimensions = array<i32: 0>} : vector<32x32xi32>
    %52 = tpu.iota {dimensions = array<i32: 1>} : vector<32x32xi32>
    %c1_i32 = arith.constant 1 : i32
    %53 = vector.broadcast %c1_i32 : i32 to vector<32x32xi32>
    %54 = arith.subi %51, %53 : vector<32x32xi32>
    %55 = arith.cmpi eq, %52, %54 : vector<32x32xi32>
    %c16_i32 = arith.constant 16 : i32
    %c0_i32 = arith.constant 0 : i32
    %56 = arith.cmpi eq, %c16_i32, %c0_i32 : i32
    %c1_i32_34 = arith.constant 1 : i32
    %57 = arith.select %56, %c1_i32_34, %c16_i32 : i32
    %58 = vector.broadcast %57 : i32 to vector<32x32xi32>
    %59 = arith.remsi %51, %58 : vector<32x32xi32>
    %c0_i32_35 = arith.constant 0 : i32
    %60 = vector.broadcast %c0_i32_35 : i32 to vector<32x32xi32>
    %61 = arith.cmpi ne, %59, %60 : vector<32x32xi32>
    %c0_i32_36 = arith.constant 0 : i32
    %62 = vector.broadcast %c0_i32_36 : i32 to vector<32x32xi32>
    %63 = arith.cmpi slt, %59, %62 : vector<32x32xi32>
    %c0_i32_37 = arith.constant 0 : i32
    %64 = arith.cmpi slt, %57, %c0_i32_37 : i32
    %65 = vector.broadcast %64 : i1 to vector<32x32xi1>
    %66 = vector.broadcast %65 : vector<32x32xi1> to vector<32x32xi1>
    %67 = arith.xori %63, %66 : vector<32x32xi1>
    %68 = arith.andi %67, %61 : vector<32x32xi1>
    %69 = vector.broadcast %57 : i32 to vector<32x32xi32>
    %70 = arith.addi %59, %69 : vector<32x32xi32>
    %71 = arith.select %68, %70, %59 : vector<32x32xi1>, vector<32x32xi32>
    %c0_i32_38 = arith.constant 0 : i32
    %72 = vector.broadcast %c0_i32_38 : i32 to vector<32x32xi32>
    %73 = arith.cmpi ne, %71, %72 : vector<32x32xi32>
    %74 = arith.andi %55, %73 : vector<32x32xi1>
    %75 = arith.extui %74 : vector<32x32xi1> to vector<32x32xi32>
    %76 = arith.sitofp %75 : vector<32x32xi32> to vector<32x32xf32>
    %c1_i32_39 = arith.constant 1 : i32
    %77 = vector.broadcast %c1_i32_39 : i32 to vector<32x32xi32>
    %78 = arith.addi %51, %77 : vector<32x32xi32>
    %79 = arith.cmpi eq, %52, %78 : vector<32x32xi32>
    %c16_i32_40 = arith.constant 16 : i32
    %c0_i32_41 = arith.constant 0 : i32
    %80 = arith.cmpi eq, %c16_i32_40, %c0_i32_41 : i32
    %c1_i32_42 = arith.constant 1 : i32
    %81 = arith.select %80, %c1_i32_42, %c16_i32_40 : i32
    %82 = vector.broadcast %81 : i32 to vector<32x32xi32>
    %83 = arith.remsi %51, %82 : vector<32x32xi32>
    %c0_i32_43 = arith.constant 0 : i32
    %84 = vector.broadcast %c0_i32_43 : i32 to vector<32x32xi32>
    %85 = arith.cmpi ne, %83, %84 : vector<32x32xi32>
    %c0_i32_44 = arith.constant 0 : i32
    %86 = vector.broadcast %c0_i32_44 : i32 to vector<32x32xi32>
    %87 = arith.cmpi slt, %83, %86 : vector<32x32xi32>
    %c0_i32_45 = arith.constant 0 : i32
    %88 = arith.cmpi slt, %81, %c0_i32_45 : i32
    %89 = vector.broadcast %88 : i1 to vector<32x32xi1>
    %90 = vector.broadcast %89 : vector<32x32xi1> to vector<32x32xi1>
    %91 = arith.xori %87, %90 : vector<32x32xi1>
    %92 = arith.andi %91, %85 : vector<32x32xi1>
    %93 = vector.broadcast %81 : i32 to vector<32x32xi32>
    %94 = arith.addi %83, %93 : vector<32x32xi32>
    %95 = arith.select %92, %94, %83 : vector<32x32xi1>, vector<32x32xi32>
    %c15_i32 = arith.constant 15 : i32
    %96 = vector.broadcast %c15_i32 : i32 to vector<32x32xi32>
    %97 = arith.cmpi ne, %95, %96 : vector<32x32xi32>
    %98 = arith.andi %79, %97 : vector<32x32xi1>
    %99 = arith.extui %98 : vector<32x32xi1> to vector<32x32xi32>
    %100 = arith.sitofp %99 : vector<32x32xi32> to vector<32x32xf32>
    %cst_46 = arith.constant dense<0.000000e+00> : vector<32x32xf32>
    %101 = tpu.matmul %76, %44, %cst_46 {dimension_numbers = #tpu.dot_dimension_numbers<[1], [0], [0], [1], [0, 0, 1, 1], [], []>} : vector<32x32xf32>, vector<32x32xf32>, vector<32x32xf32> -> vector<32x32xf32>
    %102 = arith.addf %47, %101 : vector<32x32xf32>
    %cst_47 = arith.constant dense<0.000000e+00> : vector<32x32xf32>
    %103 = tpu.matmul %100, %50, %cst_47 {dimension_numbers = #tpu.dot_dimension_numbers<[1], [0], [0], [1], [0, 0, 1, 1], [], []>} : vector<32x32xf32>, vector<32x32xf32>, vector<32x32xf32> -> vector<32x32xf32>
    %104 = arith.addf %102, %103 : vector<32x32xf32>
    %cst_48 = arith.constant dense<0.000000e+00> : vector<32xf32>
    %105 = vector.multi_reduction <add>, %104, %cst_48 [0] : vector<32x32xf32> to vector<32xf32>
    %106 = vector.shape_cast %105 : vector<32xf32> to vector<1x32xf32>
    %107 = arith.mulf %104, %104 : vector<32x32xf32>
    %cst_49 = arith.constant dense<0.000000e+00> : vector<32xf32>
    %108 = vector.multi_reduction <add>, %107, %cst_49 [0] : vector<32x32xf32> to vector<32xf32>
    %109 = vector.shape_cast %108 : vector<32xf32> to vector<1x32xf32>
    %110 = tpu.concatenate %106, %109 in 0 : vector<1x32xf32>, vector<1x32xf32> -> vector<2x32xf32>
    %cst_50 = arith.constant dense<0.000000e+00> : vector<2x2xf32>
    %111 = tpu.matmul %110, %1, %cst_50 {dimension_numbers = #tpu.dot_dimension_numbers<[1], [0], [0], [1], [0, 0, 1, 1], [], []>} : vector<2x32xf32>, vector<32x2xf32>, vector<2x2xf32> -> vector<2x2xf32>
    %112 = vector.extract_strided_slice %111 {offsets = [0, 0], sizes = [1, 2], strides = [1, 1]} : vector<2x2xf32> to vector<1x2xf32>
    %113 = vector.extract_strided_slice %111 {offsets = [1, 0], sizes = [1, 2], strides = [1, 1]} : vector<2x2xf32> to vector<1x2xf32>
    %114 = arith.mulf %112, %112 : vector<1x2xf32>
    %115 = arith.subf %113, %114 : vector<1x2xf32>
    %cst_51 = arith.constant 9.99999974E-6 : f32
    %116 = vector.broadcast %cst_51 : f32 to vector<1x2xf32>
    %117 = arith.addf %115, %116 : vector<1x2xf32>
    %118 = math.rsqrt %117 : vector<1x2xf32>
    %119 = arith.mulf %6, %118 : vector<1x2xf32>
    %120 = arith.mulf %112, %119 : vector<1x2xf32>
    %121 = arith.subf %7, %120 : vector<1x2xf32>
    %122 = tpu.concatenate %119, %121 in 0 : vector<1x2xf32>, vector<1x2xf32> -> vector<2x2xf32>
    %cst_52 = arith.constant dense<0.000000e+00> : vector<2x32xf32>
    %123 = tpu.matmul %122, %3, %cst_52 {dimension_numbers = #tpu.dot_dimension_numbers<[1], [0], [0], [1], [0, 0, 1, 1], [], []>} : vector<2x2xf32>, vector<2x32xf32>, vector<2x32xf32> -> vector<2x32xf32>
    %124 = vector.extract_strided_slice %123 {offsets = [0, 0], sizes = [1, 32], strides = [1, 1]} : vector<2x32xf32> to vector<1x32xf32>
    %125 = vector.broadcast %124 : vector<1x32xf32> to vector<32x32xf32>
    %126 = arith.mulf %104, %125 : vector<32x32xf32>
    %127 = vector.extract_strided_slice %123 {offsets = [1, 0], sizes = [1, 32], strides = [1, 1]} : vector<2x32xf32> to vector<1x32xf32>
    %128 = vector.broadcast %127 : vector<1x32xf32> to vector<32x32xf32>
    %129 = arith.addf %126, %128 : vector<32x32xf32>
    %cst_53 = arith.constant 0.000000e+00 : f32
    %130 = vector.broadcast %cst_53 : f32 to vector<32x32xf32>
    %131 = arith.maximumf %129, %130 : vector<32x32xf32>
    %132 = arith.truncf %131 : vector<32x32xf32> to vector<32x32xbf16>
    %c0_54 = arith.constant 0 : index
    %c0_55 = arith.constant 0 : index
    %133 = vector.load %arg3[%c0_54, %c0_55] : memref<32x128xbf16, #tpu.memory_space<vmem>>, vector<32x128xbf16>
    %cst_56 = arith.constant dense<0.000000e+00> : vector<32x128xf32>
    %134 = tpu.matmul %132, %133, %cst_56 {dimension_numbers = #tpu.dot_dimension_numbers<[1], [0], [0], [1], [0, 0, 1, 1], [], []>} : vector<32x32xbf16>, vector<32x128xbf16>, vector<32x128xf32> -> vector<32x128xf32>
    %c0_57 = arith.constant 0 : index
    %c0_58 = arith.constant 0 : index
    %135 = vector.load %arg4[%c0_57, %c0_58] : memref<64x128xbf16, #tpu.memory_space<vmem>>, vector<64x128xbf16>
    %cst_59 = arith.constant dense<0.000000e+00> : vector<32x128xf32>
    %136 = tpu.matmul %11, %135, %cst_59 {dimension_numbers = #tpu.dot_dimension_numbers<[1], [0], [0], [1], [0, 0, 1, 1], [], []>} : vector<32x64xbf16>, vector<64x128xbf16>, vector<32x128xf32> -> vector<32x128xf32>
    %cst_60 = arith.constant dense<0.000000e+00> : vector<128xf32>
    %137 = vector.multi_reduction <add>, %136, %cst_60 [0] : vector<32x128xf32> to vector<128xf32>
    %138 = vector.shape_cast %137 : vector<128xf32> to vector<1x128xf32>
    %139 = arith.mulf %136, %136 : vector<32x128xf32>
    %cst_61 = arith.constant dense<0.000000e+00> : vector<128xf32>
    %140 = vector.multi_reduction <add>, %139, %cst_61 [0] : vector<32x128xf32> to vector<128xf32>
    %141 = vector.shape_cast %140 : vector<128xf32> to vector<1x128xf32>
    %142 = tpu.concatenate %138, %141 in 0 : vector<1x128xf32>, vector<1x128xf32> -> vector<2x128xf32>
    %cst_62 = arith.constant dense<0.000000e+00> : vector<2x8xf32>
    %143 = tpu.matmul %142, %0, %cst_62 {dimension_numbers = #tpu.dot_dimension_numbers<[1], [0], [0], [1], [0, 0, 1, 1], [], []>} : vector<2x128xf32>, vector<128x8xf32>, vector<2x8xf32> -> vector<2x8xf32>
    %144 = vector.extract_strided_slice %143 {offsets = [0, 0], sizes = [1, 8], strides = [1, 1]} : vector<2x8xf32> to vector<1x8xf32>
    %145 = vector.extract_strided_slice %143 {offsets = [1, 0], sizes = [1, 8], strides = [1, 1]} : vector<2x8xf32> to vector<1x8xf32>
    %146 = arith.mulf %144, %144 : vector<1x8xf32>
    %147 = arith.subf %145, %146 : vector<1x8xf32>
    %cst_63 = arith.constant 9.99999974E-6 : f32
    %148 = vector.broadcast %cst_63 : f32 to vector<1x8xf32>
    %149 = arith.addf %147, %148 : vector<1x8xf32>
    %150 = math.rsqrt %149 : vector<1x8xf32>
    %151 = arith.mulf %8, %150 : vector<1x8xf32>
    %152 = arith.mulf %144, %151 : vector<1x8xf32>
    %153 = arith.subf %9, %152 : vector<1x8xf32>
    %154 = tpu.concatenate %151, %153 in 0 : vector<1x8xf32>, vector<1x8xf32> -> vector<2x8xf32>
    %cst_64 = arith.constant dense<0.000000e+00> : vector<2x128xf32>
    %155 = tpu.matmul %154, %2, %cst_64 {dimension_numbers = #tpu.dot_dimension_numbers<[1], [0], [0], [1], [0, 0, 1, 1], [], []>} : vector<2x8xf32>, vector<8x128xf32>, vector<2x128xf32> -> vector<2x128xf32>
    %156 = vector.extract_strided_slice %155 {offsets = [0, 0], sizes = [1, 128], strides = [1, 1]} : vector<2x128xf32> to vector<1x128xf32>
    %157 = vector.broadcast %156 : vector<1x128xf32> to vector<32x128xf32>
    %158 = arith.mulf %136, %157 : vector<32x128xf32>
    %159 = vector.extract_strided_slice %155 {offsets = [1, 0], sizes = [1, 128], strides = [1, 1]} : vector<2x128xf32> to vector<1x128xf32>
    %160 = vector.broadcast %159 : vector<1x128xf32> to vector<32x128xf32>
    %161 = arith.addf %158, %160 : vector<32x128xf32>
    %162 = arith.addf %134, %161 : vector<32x128xf32>
    %cst_65 = arith.constant 0.000000e+00 : f32
    %163 = vector.broadcast %cst_65 : f32 to vector<32x128xf32>
    %164 = arith.maximumf %162, %163 : vector<32x128xf32>
    %c0_66 = arith.constant 0 : index
    %c0_67 = arith.constant 0 : index
    %165 = vector.load %arg8[%c0_66, %c0_67] : memref<32x128xf32, #tpu.memory_space<vmem>>, vector<32x128xf32>
    tpu.vector_store %arg8[%c0_66, %c0_67], %164 {strides = array<i32>} : memref<32x128xf32, #tpu.memory_space<vmem>>, vector<32x128xf32>,
    return
  }
}

</mosaic_0001>

<bundles_post_ra>
// kernel: bottleneck_forward.1
= control target key start
LH: loop header
LB: loop body
LE: loop exit
PB: predicated region body
PF: predicated region fallthrough
CT: control target
= control target key end

     0   :  { %vm96_vm0 = vcmask 523264   ;;  %v1779_v10 = vmov 0.0   ;;  %vm1780_vm1 = vmmov 0   ;;  %vm152_vm2 = vcmask 261120   ;;  %s2207_s1 = inlined_call_operand.vmem [shape: bf16[64,32], index: 1, kind: input, shape index: {}]   ;;  %s2208_s0 = inlined_call_operand.vmem [shape: f32[32,64], index: 0, kind: input, shape index: {}]   ;;  %s2209_s5 = inlined_call_operand.vmem [shape: f32[160,8], index: 5, kind: input, shape index: {}]   ;;  %s2210_s6 = inlined_call_operand.vmem [shape: f32[10,128], index: 6, kind: input, shape index: {}]   ;;  %s2211_s7 = inlined_call_operand.vmem [shape: f32[6,8], index: 7, kind: input, shape index: {}]   ;;  %s2212_s2 = inlined_call_operand.vmem [shape: bf16[3,32,32], index: 2, kind: input, shape index: {}]   ;;  %s2213_s4 = inlined_call_operand.vmem [shape: bf16[64,128], index: 4, kind: input, shape index: {}]   ;;  %s2214_s3 = inlined_call_operand.vmem [shape: bf16[32,128], index: 3, kind: input, shape index: {}]   ;;  %s2215_s8 = inlined_call_operand.vmem [shape: f32[32,128], index: 8, kind: output, shape index: {}]  }
   0x1   :  { %v1757_v0 = vld [vmem:[%s2207_s1 + $0x18] sm:$0xff]   ;;  %v1758_v1 = vld [vmem:[%s2207_s1 + $0x10] sm:$0xff]   ;;  %v1759_v2 = vld [vmem:[%s2207_s1 + $0x8] sm:$0xff]   ;;  %1611 = vmatprep.subr.mxu1 %v1779_v10  ;;  %1619 = vmatprep.mubr.msk.f32.mxu1 %vm1780_vm1, %v1779_v10  ;;  %vm183_vm3 = vcmask 1040384   ;;  %vm279_vm4 = vcmask 1041408   ;;  %vm275_vm5 = vcmask 15360  }
   0x2   :  { %1599 = vmatprep.subr.bf16.mxu0 %v1757_v0  ;;  %v58_v3 = vld [vmem:[%s2208_s0] sm:$0xff]  ;;  %v59_v4 = vld [vmem:[%s2208_s0 + $0x8] sm:$0xff]  ;;  %v60_v7 = vld [vmem:[%s2208_s0 + $0x10] sm:$0xff] }
   0x3   :  { %1600 = vmatpush3.bf16.msra.mxu0 %v1757_v0  ;;  %v1841_v5 = vpack.c.bf16 %v59_v4, %v58_v3  ;;  %v1760_v6 = vld [vmem:[%s2207_s1] sm:$0xff]   ;;  %v61_v8 = vld [vmem:[%s2208_s0 + $0x18] sm:$0xff]  ;;  %v1867_v12 = vld [vmem:[%s2209_s5 + $0x90] sm:$0xff] }
   0x4   :  { %1601 = vmatprep.subr.bf16.mxu0 %v1758_v1  ;;  %v1854_v9 = vpack.c.bf16 %v61_v8, %v60_v7  ;;  %v1862_v11 = vld [vmem:[%s2209_s5 + $0x98] sm:$0xff]  ;;  %v1876_v13 = vld [vmem:[%s2209_s5 + $0x88] sm:$0xff]  ;;  %v1883_v14 = vld [vmem:[%s2209_s5 + $0x80] sm:$0xff]  ;;  %v353_v8 = vlaneseq }
   0x5   :  { %1607 = vmatprep.mubr.msk.bf16.mxu0 %vm96_vm0, %v1841_v5  ;;  %1612 = vmatpush3.msra.mxu1 %v1862_v11  ;;  %v1924_v50 = vld [vmem:[%s2210_s6 + $0x8] sm:$0x3]  ;;  %v52_v58 = vld [vmem:[%s2211_s7] sm:$0x1]  ;;  %v53_v61 = vld [vmem:[%s2211_s7 + $0x1] sm:$0x1] }
   0x6   :  { %1613 = vmatprep.subr.mxu1 %v1779_v10  ;;  %v1762_v3 = vld [vmem:[%s2212_s2 + $0x28] sm:$0xff]   ;;  %v1763_v4 = vld [vmem:[%s2212_s2] sm:$0xff]   ;;  %v1765_v7 = vld [vmem:[%s2212_s2 + $0x18] sm:$0xff]  }
   0x7   :  { %1602 = vmatpush3.bf16.msra.mxu0 %v1758_v1  ;;  %1614 = vmatpush3.msra.mxu1 %v1867_v12 }
   0x8   :  { %1603 = vmatprep.subr.bf16.mxu0 %v1759_v2  ;;  %1615 = vmatprep.subr.mxu1 %v1779_v10 }
   0x9   :  { %1616 = vmatpush3.msra.mxu1 %v1876_v13 }
   0xa   :  { %1617 = vmatprep.subr.mxu1 %v1779_v10 }
   0xb   :  { %1604 = vmatpush3.bf16.msra.mxu0 %v1759_v2  ;;  %1618 = vmatpush3.msra.mxu1 %v1883_v14  ;;  %v1761_v2 = vld [vmem:[%s2212_s2 + $0x8] sm:$0xff]  }
   0xc   :  { %1605 = vmatprep.subr.bf16.mxu0 %v1760_v6  ;;  %1622 = vmatprep.subr.mxu1 %v1779_v10 }
   0xf   :  { %1606 = vmatpush3.bf16.msra.mxu0 %v1760_v6  ;;  %v1764_v6 = vld [vmem:[%s2212_s2 + $0x20] sm:$0xff]  }
  0x10   :  { %1635 = vmatprep.subr.bf16.mxu0 %v1762_v3 }
  0x12   :  { %1608 = vmatmul.mubr.msk.bf16.vlgmr.msra.gmra.mxu0 %vm96_vm0, %v1854_v9 }
  0x13   :  { %1636 = vmatpush3.bf16.msra.mxu0 %v1762_v3  ;;  %v1768_v3 = vld [vmem:[%s2213_s4 + $0x10] sm:$0xff]  }
  0x14   :  { %1637 = vmatprep.subr.bf16.mxu0 %v1764_v6 }
  0x17   :  { %1638 = vmatpush3.bf16.msra.mxu0 %v1764_v6 }
  0x18   :  { %1657 = vmatprep.subr.bf16.mxu0 %v1765_v7 }
  0xd2   :  { %v1889_v15 = vpop.f32.mrf.mxu0 }
  0xd3   :  { %v168_v20 = vmul.f32 %v1889_v15, %v1889_v15  ;;  %v156_v25 = vsel %vm152_vm2, %v1889_v15, 0.0 }
  0xd4   :  { %v1891_v16 = vpop.f32.mrf.mxu0 }
  0xd5   :  { %v166_v18 = vmul.f32 %v1891_v16, %v1891_v16  ;;  %v153_v21 = vsel %vm152_vm2, %v1891_v16, 0.0  ;;  %v173_v31 = vsel %vm152_vm2, %v168_v20, 0.0 }
  0xd6   :  { %v1893_v17 = vpop.f32.mrf.mxu0 }
  0xd7   :  { %v170_v26 = vsel %vm152_vm2, %v166_v18, 0.0  ;;  %v169_v27 = vmul.f32 %v1893_v17, %v1893_v17  ;;  %v158_v32 = vsel %vm152_vm2, %v1893_v17, 0.0  ;;  %v1951_v18 = vshrl.u32 %v353_v8, 7 }
  0xd8   :  { %v1897_v19 = vpop.f32.mrf.mxu0 }
  0xd9   :  { %v154_v22 = vsel %vm152_vm2, %v1897_v19, 0.0  ;;  %v167_v23 = vmul.f32 %v1897_v19, %v1897_v19  ;;  %v175_v35 = vsel %vm152_vm2, %v169_v27, 0.0  ;;  %v1954_v20 = vsub.s32 0, %v1951_v18 }
  0xda   :  { %v155_v24 = vadd.f32 %v154_v22, %v153_v21  ;;  %v1957_v21 = vsub.s32 1, %v1951_v18 }
  0xdb   :  { %v171_v28 = vsel %vm152_vm2, %v167_v23, 0.0 }
  0xdc   :  { %v157_v29 = vadd.f32 %v156_v25, %v155_v24  ;;  %v172_v30 = vadd.f32 %v171_v28, %v170_v26 }
  0xde   :  { %v159_v33 = vadd.f32 %v158_v32, %v157_v29  ;;  %v174_v34 = vadd.f32 %v173_v31, %v172_v30 }
  0xe0   :  { %v160_v36 = vrot.slane %v159_v33, 4  ;;  %v176_v37 = vadd.f32 %v175_v35, %v174_v34 }
  0xe2   :  { %v161_v38 = vadd.f32 %v160_v36, %v159_v33  ;;  %v177_v39 = vrot.slane %v176_v37, 4 }
  0xe4   :  { %v162_v40 = vrot.slane %v161_v38, 2  ;;  %v178_v41 = vadd.f32 %v177_v39, %v176_v37 }
  0xe6   :  { %v163_v42 = vadd.f32 %v162_v40, %v161_v38  ;;  %v179_v43 = vrot.slane %v178_v41, 2 }
  0xe8   :  { %v164_v44 = vrot.slane %v163_v42, 1  ;;  %v180_v45 = vadd.f32 %v179_v43, %v178_v41 }
  0xea   :  { %v181_v46 = vrot.slane %v180_v45, 1  ;;  %v165_v47 = vadd.f32 %v164_v44, %v163_v42  ;;  %v521_v44 = vadd.s32 24, %v1951_v18 }
  0xec   :  { %v182_v48 = vadd.f32 %v181_v46, %v180_v45 }
  0xee   :  { %v184_v49 = vsel %vm183_vm3, %v165_v47, %v182_v48  ;;  %v1487_v47 = vadd.s32 4294967295, %v521_v44  ;;  %v596_v48 = vadd.s32 1, %v1951_v18 }
  0xef   :  { %1620 = vmatmul.mubr.msk.f32.vlgmr.msra.gmra.mxu1 %vm152_vm2, %v184_v49 }
  0xf0   :  { %1624 = vmatprep.mubr.msk.f32.mxu1 %vm1780_vm1, %v1779_v10  ;;  %1623 = vmatpush3.msk.msra.mxu1 %vm279_vm4, %v1924_v50 }
  0xf1   :  { %1627 = vmatprep.subr.bf16.mxu1 %v1761_v2 }
 0x1af   :  { %v254_v51 = vpop.f32.mrf.mxu1 }
 0x1b0   :  { %v258_v52 = vmul.f32 %v254_v51, %v254_v51 }
 0x1b1   :  { %v1621_v53 = vpop.f32.mrf.mxu1 }
 0x1b2   :  { %v260_v54 = vrot.slane %v258_v52, 7 }
 0x1b4   :  { %v262_v55 = vsub.f32 %v254_v51, %v260_v54 }
 0x1b6   :  { %v263_v56 = vadd.f32 1e-05, %v262_v55 }
 0x1b8   :  { %1773 = vrsqrt.f32 %v263_v56 }
 0x1c5   :  { %v1774_v57 = vpop.eup %1773 }
 0x1c6   :  { %v266_v59 = vrot.slane %v1774_v57, 1 }
 0x1c8   :  { %v268_v60 = vmul.f32 %v266_v59, %v52_v58  ;;  %v557_v58 = vand.u32 15, %v521_v44  ;;  %v599_v59 = vadd.s32 1, %v521_v44 }
 0x1ca   :  { %v269_v62 = vmul.f32 %v268_v60, %v254_v51 }
 0x1cc   :  { %v270_v63 = vsub.f32 %v53_v61, %v269_v62 }
 0x1ce   :  { %v272_v0 = vrot.slane %v270_v63, 7 }
 0x1d0   :  { %v274_v1 = vsel %vm183_vm3, %v268_v60, %v272_v0 }
 0x1d1   :  { %1625 = vmatmul.mubr.msk.f32.vlgmr.msra.gmra.mxu1 %vm275_vm5, %v274_v1 }
 0x1d2   :  { %1628 = vmatpush3.bf16.msra.mxu1 %v1761_v2  ;;  %v1767_v2 = vld [vmem:[%s2213_s4 + $0x18] sm:$0xff]  }
 0x1d3   :  { %1629 = vmatprep.subr.bf16.mxu1 %v1763_v4 }
 0x1d6   :  { %1630 = vmatpush3.bf16.msra.mxu1 %v1763_v4  ;;  %v1769_v4 = vld [vmem:[%s2213_s4 + $0x8] sm:$0xff]  }
 0x291   :  { %v349_v22 = vpop.f32.mrf.mxu1 }
 0x292   :  { %v356_v23 = vrot.slane %v349_v22, %v1954_v20  ;;  %v364_v24 = vrot.slane %v349_v22, %v1957_v21 }
 0x293   :  { %v1626_v25 = vpop.f32.mrf.mxu1 }
 0x294   :  { %v357_v26 = vmul.f32 %v356_v23, %v1891_v16  ;;  %v358_v27 = vmul.f32 %v356_v23, %v1897_v19  ;;  %v359_v28 = vmul.f32 %v1889_v15, %v356_v23  ;;  %v360_v29 = vmul.f32 %v1893_v17, %v356_v23  ;;  %v1766_v16 = vld [vmem:[%s2212_s2 + $0x10] sm:$0xff]  }
 0x295   :  { %v1985_v15 = vand.u32 127, %v353_v8  ;;  %v536_v17 = vand.u32 15, %v1951_v18 }
 0x296   :  { %v365_v30 = vadd.f32 %v364_v24, %v357_v26  ;;  %v366_v31 = vadd.f32 %v364_v24, %v358_v27  ;;  %v367_v32 = vadd.f32 %v364_v24, %v359_v28  ;;  %v368_v33 = vadd.f32 %v364_v24, %v360_v29 }
 0x297   :  { %vm580_vm7 = vcmp.ne.s32.totalorder %v536_v17, 0  ;;  %vm531_vm13 = vcmp.eq.s32.totalorder %v1985_v15, %v1487_v47  ;;  %vm600_vm14 = vcmp.eq.s32.totalorder %v1985_v15, %v596_v48 }
 0x298   :  { %v371_v34 = vmax.f32 %v367_v32, 0.0  ;;  %v372_v35 = vmax.f32 %v368_v33, 0.0  ;;  %v369_v36 = vmax.f32 %v365_v30, 0.0  ;;  %v370_v37 = vmax.f32 %v366_v31, 0.0 }
 0x299   :  { %v1491_v60 = vsel %vm531_vm13, 1.0, %v1779_v10  ;;  %v1492_v61 = vsel %vm600_vm14, 1.0, %v1779_v10 }
 0x29a   :  { %v373_v38 = vpack.c.bf16 %v370_v37, %v369_v36  ;;  %v374_v39 = vpack.c.bf16 %v372_v35, %v371_v34 }
 0x29c   :  { %1631 = vmatprep.mubr.msk.bf16.mxu1 %vm152_vm2, %v373_v38  ;;  %1639 = vmatprep.mubr.msk.bf16.mxu0 %vm152_vm2, %v373_v38 }
 0x29d   :  { %1632 = vmatmul.mubr.msk.bf16.vlgmr.msra.gmra.mxu1 %vm152_vm2, %v374_v39  ;;  %1640 = vmatmul.mubr.msk.bf16.vlgmr.msra.gmra.mxu0 %vm152_vm2, %v374_v39 }
 0x29e   :  { %1658 = vmatpush3.bf16.msra.mxu0 %v1765_v7  ;;  %1661 = vmatprep.mubr.msk.bf16.mxu0 %vm152_vm2, %v373_v38 }
 0x29f   :  { %1659 = vmatprep.subr.bf16.mxu0 %v1766_v16 }
 0x2a2   :  { %1660 = vmatpush3.bf16.msra.mxu0 %v1766_v16 }
 0x2a3   :  { %1679 = vmatprep.subr.mxu0 %v1779_v10 }
 0x2a5   :  { %1662 = vmatmul.mubr.msk.bf16.vlgmr.msra.gmra.mxu0 %vm152_vm2, %v374_v39 }
 0x2a6   :  { %1680 = vmatpush3.msra.mxu0 %v1862_v11  ;;  %1687 = vmatprep.mubr.msk.f32.mxu0 %vm1780_vm1, %v1779_v10  ;;  %v1484_v11 = vadd.s32 4294967295, %v1951_v18 }
 0x2a7   :  { %1681 = vmatprep.subr.mxu0 %v1779_v10 }
 0x2a8   :  { %1682 = vmatpush3.msra.mxu0 %v1867_v12  ;;  %vm528_vm6 = vcmp.eq.s32.totalorder %v1985_v15, %v1484_v11 }
 0x2a9   :  { %1683 = vmatprep.subr.mxu0 %v1779_v10  ;;  %vm584_vm8 = vmand %vm528_vm6, %vm580_vm7 }
 0x2aa   :  { %1684 = vmatpush3.msra.mxu0 %v1876_v13  ;;  %v1488_v12 = vsel %vm584_vm8, 1.0, %v1779_v10  ;;  %v520_v13 = vadd.s32 16, %v1951_v18 }
 0x2ab   :  { %1685 = vmatprep.subr.mxu0 %v1779_v10  ;;  %1651 = vmatprep.mubr.msk.f32.mxu1 %vm152_vm2, %v1488_v12 }
 0x2ac   :  { %1686 = vmatpush3.msra.mxu0 %v1883_v14  ;;  %v519_v14 = vadd.s32 8, %v1951_v18  ;;  %v1486_v40 = vadd.s32 4294967295, %v520_v13  ;;  %v550_v41 = vand.u32 15, %v520_v13  ;;  %v598_v57 = vadd.s32 1, %v520_v13 }
 0x2ad   :  { %1690 = vmatprep.subr.mxu0 %v1779_v10 }
 0x2ae   :  { %v1485_v43 = vadd.s32 4294967295, %v519_v14  ;;  %vm530_vm9 = vcmp.eq.s32.totalorder %v1985_v15, %v1486_v40  ;;  %vm582_vm10 = vcmp.ne.s32.totalorder %v550_v41, 0  ;;  %v597_v49 = vadd.s32 1, %v519_v14 }
 0x2af   :  { %vm586_vm12 = vmand %vm530_vm9, %vm582_vm10  ;;  %v543_v53 = vand.u32 15, %v519_v14  ;;  %vm602_vm8 = vcmp.eq.s32.totalorder %v1985_v15, %v598_v57  ;;  %vm603_vm9 = vcmp.eq.s32.totalorder %v1985_v15, %v599_v59  ;;  %vm607_vm10 = vcmp.ne.s32.totalorder %v557_v58, 15 }
 0x2b0   :  { %vm529_vm11 = vcmp.eq.s32.totalorder %v1985_v15, %v1485_v43  ;;  %v1490_v55 = vsel %vm586_vm12, 1.0, %v1779_v10  ;;  %vm601_vm15 = vcmp.eq.s32.totalorder %v1985_v15, %v597_v49  ;;  %v1494_v0 = vsel %vm602_vm8, 1.0, %v1779_v10 }
 0x2b1   :  { %v1489_v54 = vsel %vm529_vm11, 1.0, %v1779_v10  ;;  %vm605_vm6 = vcmp.ne.s32.totalorder %v543_v53, 15  ;;  %vm611_vm11 = vmand %vm603_vm9, %vm607_vm10 }
 0x2b2   :  { %vm609_vm7 = vmand %vm601_vm15, %vm605_vm6  ;;  %v1495_v1 = vsel %vm611_vm11, 1.0, %v1779_v10 }
 0x2b3   :  { %v1493_v63 = vsel %vm609_vm7, 1.0, %v1779_v10 }
 0x35d   :  { %v1633_v19 = vpop.f32.mrf.mxu1  ;;  %v1641_v45 = vpop.f32.mrf.mxu0 }
 0x35f   :  { %v431_v42 = vpop.f32.mrf.mxu1  ;;  %v502_v51 = vpop.f32.mrf.mxu0 }
 0x361   :  { %v1634_v46 = vpop.f32.mrf.mxu1  ;;  %v1642_v56 = vpop.f32.mrf.mxu0 }
 0x362   :  { %1643 = vmatprep.subr.mxu1 %v1634_v46 }
 0x363   :  { %1644 = vmatpush3.msra.mxu1 %v1634_v46  ;;  %v434_v52 = vpop.f32.mrf.mxu1  ;;  %v505_v62 = vpop.f32.mrf.mxu0 }
 0x364   :  { %1645 = vmatprep.subr.mxu1 %v1633_v19 }
 0x365   :  { %1646 = vmatpush3.msra.mxu1 %v1633_v19  ;;  %v1663_v6 = vpop.f32.mrf.mxu0 }
 0x366   :  { %1647 = vmatprep.subr.mxu1 %v434_v52 }
 0x367   :  { %1648 = vmatpush3.msra.mxu1 %v434_v52  ;;  %v763_v7 = vpop.f32.mrf.mxu0 }
 0x368   :  { %1649 = vmatprep.subr.mxu1 %v431_v42 }
 0x369   :  { %1650 = vmatpush3.msra.mxu1 %v431_v42  ;;  %v1664_v18 = vpop.f32.mrf.mxu0 }
 0x36a   :  { %1652 = vmatmul.mubr.msk.f32.vlgmr.msra.gmra.mxu1 %vm152_vm2, %v1489_v54  ;;  %1665 = vmatprep.subr.mxu1 %v1642_v56 }
 0x36b   :  { %1666 = vmatpush3.msra.mxu1 %v1642_v56  ;;  %1654 = vmatprep.mubr.msk.f32.mxu1 %vm152_vm2, %v1490_v55  ;;  %v766_v24 = vpop.f32.mrf.mxu0 }
 0x36c   :  { %1667 = vmatprep.subr.mxu1 %v1641_v45 }
 0x36d   :  { %1668 = vmatpush3.msra.mxu1 %v1641_v45 }
 0x36e   :  { %1655 = vmatmul.mubr.msk.f32.gmra.mxu1 %vm152_vm2, %v1491_v60  ;;  %1669 = vmatprep.subr.mxu1 %v505_v62 }
 0x36f   :  { %1670 = vmatpush3.msra.mxu1 %v505_v62  ;;  %1673 = vmatprep.mubr.msk.f32.mxu1 %vm152_vm2, %v1492_v61 }
 0x370   :  { %1671 = vmatprep.subr.mxu1 %v502_v51 }
 0x371   :  { %1672 = vmatpush3.msra.mxu1 %v502_v51 }
 0x372   :  { %1674 = vmatmul.mubr.msk.f32.vlgmr.msra.gmra.mxu1 %vm152_vm2, %v1493_v63  ;;  %1695 = vmatprep.subr.bf16.mxu1 %v1767_v2 }
 0x373   :  { %1676 = vmatprep.mubr.msk.f32.mxu1 %vm152_vm2, %v1494_v0  ;;  %1696 = vmatpush3.bf16.msra.mxu1 %v1767_v2 }
 0x374   :  { %1697 = vmatprep.subr.bf16.mxu1 %v1768_v3 }
 0x376   :  { %1677 = vmatmul.mubr.msk.f32.gmra.mxu1 %vm152_vm2, %v1495_v1 }
 0x377   :  { %1703 = vmatprep.mubr.msk.bf16.mxu1 %vm96_vm0, %v1841_v5  ;;  %1698 = vmatpush3.bf16.msra.mxu1 %v1768_v3  ;;  %v1770_v5 = vld [vmem:[%s2213_s4] sm:$0xff]  }
 0x378   :  { %1699 = vmatprep.subr.bf16.mxu1 %v1769_v4 }
 0x37b   :  { %1700 = vmatpush3.bf16.msra.mxu1 %v1769_v4 }
 0x37c   :  { %1701 = vmatprep.subr.bf16.mxu1 %v1770_v5 }
 0x37f   :  { %1702 = vmatpush3.bf16.msra.mxu1 %v1770_v5 }
 0x380   :  { %1742 = vmatprep.subr.mxu1 %v1779_v10 }
 0x382   :  { %1704 = vmatmul.mubr.msk.bf16.vlgmr.msra.gmra.mxu1 %vm96_vm0, %v1854_v9  ;;  %vm1290_vm0 = vcmask 64512  }
 0x383   :  { %1744 = vmatprep.mubr.msk.f32.mxu1 %vm1780_vm1, %v1779_v10 }
 0x42a   :  { %v1653_v8 = vpop.f32.mrf.mxu1 }
 0x42b   :  { %v767_v26 = vadd.f32 %v1653_v8, %v766_v24  ;;  %v55_v24 = vld [vmem:[%s2211_s7 + $0x3] sm:$0x1] }
 0x42c   :  { %v698_v22 = vpop.f32.mrf.mxu1 }
 0x42d   :  { %v764_v28 = vadd.f32 %v763_v7, %v698_v22 }
 0x42e   :  { %v1656_v23 = vpop.f32.mrf.mxu1 }
 0x42f   :  { %v775_v31 = vadd.f32 %v1664_v18, %v1656_v23 }
 0x430   :  { %v708_v25 = vpop.f32.mrf.mxu1 }
 0x431   :  { %v772_v9 = vadd.f32 %v1663_v6, %v708_v25 }
 0x432   :  { %v1675_v27 = vpop.f32.mrf.mxu1 }
 0x433   :  { %v2036_v29 = vadd.f32 %v1675_v27, %v767_v26 }
 0x434   :  { %v856_v30 = vpop.f32.mrf.mxu1 }
 0x435   :  { %v2038_v32 = vadd.f32 %v856_v30, %v764_v28  ;;  %v893_v34 = vmul.f32 %v2036_v29, %v2036_v29  ;;  %v880_v39 = vsel %vm152_vm2, %v2036_v29, 0.0 }
 0x436   :  { %v1678_v33 = vpop.f32.mrf.mxu1 }
 0x437   :  { %v879_v35 = vsel %vm152_vm2, %v2038_v32, 0.0  ;;  %v892_v36 = vmul.f32 %v2038_v32, %v2038_v32  ;;  %v2046_v37 = vadd.f32 %v1678_v33, %v775_v31  ;;  %v897_v17 = vsel %vm152_vm2, %v893_v34, 0.0 }
 0x438   :  { %v866_v38 = vpop.f32.mrf.mxu1  ;;  %v881_v11 = vadd.f32 %v880_v39, %v879_v35  ;;  %v43_v39 = vld [vmem:[%s2209_s5 + $0x68] sm:$0xff] }
 0x439   :  { %v896_v16 = vsel %vm152_vm2, %v892_v36, 0.0  ;;  %v2051_v15 = vadd.f32 %v866_v38, %v772_v9  ;;  %v895_v12 = vmul.f32 %v2046_v37, %v2046_v37  ;;  %v884_v41 = vsel %vm152_vm2, %v2046_v37, 0.0  ;;  %v45_v9 = vld [vmem:[%s2209_s5 + $0x78] sm:$0xff]  ;;  %v44_v38 = vld [vmem:[%s2209_s5 + $0x70] sm:$0xff] }
 0x43a   :  { %v898_v19 = vadd.f32 %v897_v17, %v896_v16  ;;  %v42_v17 = vld [vmem:[%s2209_s5 + $0x60] sm:$0xff] }
 0x43b   :  { %v882_v13 = vsel %vm152_vm2, %v2051_v15, 0.0  ;;  %v894_v14 = vmul.f32 %v2051_v15, %v2051_v15  ;;  %v901_v45 = vsel %vm152_vm2, %v895_v12, 0.0  ;;  %v41_v12 = vld [vmem:[%s2209_s5 + $0x58] sm:$0xff] }
 0x43c   :  { %v883_v40 = vadd.f32 %v882_v13, %v881_v11 }
 0x43d   :  { %v899_v42 = vsel %vm152_vm2, %v894_v14, 0.0 }
 0x43e   :  { %v885_v43 = vadd.f32 %v884_v41, %v883_v40  ;;  %v900_v44 = vadd.f32 %v899_v42, %v898_v19  ;;  %v40_v19 = vld [vmem:[%s2209_s5 + $0x50] sm:$0xff]  ;;  %v39_v40 = vld [vmem:[%s2209_s5 + $0x48] sm:$0xff] }
 0x440   :  { %v886_v46 = vrot.slane %v885_v43, 4  ;;  %v902_v47 = vadd.f32 %v901_v45, %v900_v44  ;;  %v37_v44 = vld [vmem:[%s2209_s5 + $0x38] sm:$0xff] }
 0x442   :  { %v887_v48 = vadd.f32 %v886_v46, %v885_v43  ;;  %v903_v49 = vrot.slane %v902_v47, 4  ;;  %v2071_v3 = vpop.f32.mrf.mxu1  ;;  %v38_v43 = vld [vmem:[%s2209_s5 + $0x40] sm:$0xff] }
 0x443   :  { %v1191_v27 = vmul.f32 %v2071_v3, %v2071_v3 }
 0x444   :  { %v888_v51 = vrot.slane %v887_v48, 2  ;;  %v904_v52 = vadd.f32 %v903_v49, %v902_v47  ;;  %v2073_v4 = vpop.f32.mrf.mxu1  ;;  %v36_v47 = vld [vmem:[%s2209_s5 + $0x30] sm:$0xff] }
 0x445   :  { %v1189_v22 = vmul.f32 %v2073_v4, %v2073_v4 }
 0x446   :  { %v889_v53 = vadd.f32 %v888_v51, %v887_v48  ;;  %v905_v54 = vrot.slane %v904_v52, 2  ;;  %v2075_v5 = vpop.f32.mrf.mxu1  ;;  %v35_v48 = vld [vmem:[%s2209_s5 + $0x28] sm:$0xff] }
 0x447   :  { %v1192_v33 = vmul.f32 %v2075_v5, %v2075_v5 }
 0x448   :  { %v890_v55 = vrot.slane %v889_v53, 1  ;;  %v906_v56 = vadd.f32 %v905_v54, %v904_v52  ;;  %v2080_v7 = vpop.f32.mrf.mxu1  ;;  %v34_v52 = vld [vmem:[%s2209_s5 + $0x20] sm:$0xff] }
 0x449   :  { %v1190_v23 = vmul.f32 %v2080_v7, %v2080_v7  ;;  %v1180_v28 = vadd.f32 %v2080_v7, %v2073_v4 }
 0x44a   :  { %v907_v57 = vrot.slane %v906_v56, 1  ;;  %v891_v58 = vadd.f32 %v890_v55, %v889_v53  ;;  %v33_v53 = vld [vmem:[%s2209_s5 + $0x18] sm:$0xff] }
 0x44b   :  { %v1193_v30 = vadd.f32 %v1190_v23, %v1189_v22  ;;  %v1181_v34 = vadd.f32 %v2071_v3, %v1180_v28 }
 0x44c   :  { %v908_v59 = vadd.f32 %v907_v57, %v906_v56  ;;  %v32_v56 = vld [vmem:[%s2209_s5 + $0x10] sm:$0xff]  ;;  %v31_v57 = vld [vmem:[%s2209_s5 + $0x8] sm:$0xff] }
 0x44d   :  { %v1194_v35 = vadd.f32 %v1193_v30, %v1191_v27  ;;  %v1182_v16 = vadd.f32 %v2075_v5, %v1181_v34 }
 0x44e   :  { %v909_v60 = vsel %vm183_vm3, %v891_v58, %v908_v59 }
 0x44f   :  { %1688 = vmatmul.mubr.msk.f32.vlgmr.msra.gmra.mxu0 %vm152_vm2, %v909_v60  ;;  %v1195_v11 = vadd.f32 %v1194_v35, %v1192_v33  ;;  %v1183_v13 = vrot.slane %v1182_v16, 4  ;;  %v30_v60 = vld [vmem:[%s2209_s5] sm:$0xff] }
 0x450   :  { %1691 = vmatpush3.msk.msra.mxu0 %vm279_vm4, %v1924_v50  ;;  %1692 = vmatprep.mubr.msk.f32.mxu0 %vm1780_vm1, %v1779_v10  ;;  %v54_v50 = vld [vmem:[%s2211_s7 + $0x2] sm:$0x1]  ;;  %v57_v33 = vld [vmem:[%s2211_s7 + $0x5] sm:$0x1] }
 0x451   :  { %1707 = vmatprep.subr.mxu0 %v1779_v10  ;;  %v1196_v14 = vrot.slane %v1195_v11, 4  ;;  %v1184_v41 = vadd.f32 %v1183_v13, %v1182_v16 }
 0x453   :  { %v1197_v42 = vadd.f32 %v1196_v14, %v1195_v11  ;;  %v1185_v45 = vrot.slane %v1184_v41, 2 }
 0x455   :  { %v1198_v46 = vrot.slane %v1197_v42, 2  ;;  %v1186_v49 = vadd.f32 %v1185_v45, %v1184_v41 }
 0x457   :  { %v1199_v51 = vadd.f32 %v1198_v46, %v1197_v42  ;;  %v1187_v54 = vrot.slane %v1186_v49, 1 }
 0x459   :  { %v1200_v55 = vrot.slane %v1199_v51, 1  ;;  %v1188_v58 = vadd.f32 %v1187_v54, %v1186_v49 }
 0x45b   :  { %v1201_v59 = vadd.f32 %v1200_v55, %v1199_v51 }
 0x50f   :  { %v979_v61 = vpop.f32.mrf.mxu0 }
 0x510   :  { %v983_v62 = vmul.f32 %v979_v61, %v979_v61 }
 0x511   :  { %v1689_v63 = vpop.f32.mrf.mxu0 }
 0x512   :  { %v985_v0 = vrot.slane %v983_v62, 7  ;;  %v50_v62 = vld [vmem:[%s2210_s6] sm:$0xff]  ;;  %v1771_v63 = vld [vmem:[%s2214_s3 + $0x8] sm:$0xff]  }
 0x513   :  { %1743 = vmatpush3.msra.mxu1 %v50_v62 }
 0x514   :  { %v987_v1 = vsub.f32 %v979_v61, %v985_v0  ;;  %1747 = vmatprep.subr.bf16.mxu1 %v1771_v63 }
 0x516   :  { %v988_v2 = vadd.f32 1e-05, %v987_v1 }
 0x518   :  { %1775 = vrsqrt.f32 %v988_v2 }
 0x525   :  { %v1776_v6 = vpop.eup %1775 }
 0x526   :  { %v991_v8 = vrot.slane %v1776_v6, 1 }
 0x528   :  { %v993_v18 = vmul.f32 %v991_v8, %v54_v50 }
 0x52a   :  { %v994_v25 = vmul.f32 %v993_v18, %v979_v61  ;;  %v1202_v61 = vsel %vm183_vm3, %v1188_v58, %v1201_v59 }
 0x52c   :  { %v995_v26 = vsub.f32 %v55_v24, %v994_v25 }
 0x52e   :  { %v997_v31 = vrot.slane %v995_v26, 7  ;;  %v56_v26 = vld [vmem:[%s2211_s7 + $0x4] sm:$0x1] }
 0x530   :  { %v999_v36 = vsel %vm183_vm3, %v993_v18, %v997_v31 }
 0x531   :  { %1693 = vmatmul.mubr.msk.f32.vlgmr.msra.gmra.mxu0 %vm275_vm5, %v999_v36 }
 0x532   :  { %1708 = vmatpush3.msra.mxu0 %v45_v9  ;;  %1739 = vmatprep.mubr.msk.f32.mxu0 %vm1780_vm1, %v1779_v10 }
 0x533   :  { %1709 = vmatprep.subr.mxu0 %v1779_v10 }
 0x534   :  { %1710 = vmatpush3.msra.mxu0 %v44_v38 }
 0x535   :  { %1711 = vmatprep.subr.mxu0 %v1779_v10 }
 0x536   :  { %1712 = vmatpush3.msra.mxu0 %v43_v39 }
 0x537   :  { %1713 = vmatprep.subr.mxu0 %v1779_v10 }
 0x538   :  { %1714 = vmatpush3.msra.mxu0 %v42_v17  ;;  %v1772_v17 = vld [vmem:[%s2214_s3] sm:$0xff]  }
 0x539   :  { %1715 = vmatprep.subr.mxu0 %v1779_v10 }
 0x53a   :  { %1716 = vmatpush3.msra.mxu0 %v41_v12 }
 0x53b   :  { %1717 = vmatprep.subr.mxu0 %v1779_v10 }
 0x53c   :  { %1718 = vmatpush3.msra.mxu0 %v40_v19 }
 0x53d   :  { %1719 = vmatprep.subr.mxu0 %v1779_v10 }
 0x53e   :  { %1720 = vmatpush3.msra.mxu0 %v39_v40 }
 0x53f   :  { %1721 = vmatprep.subr.mxu0 %v1779_v10 }
 0x540   :  { %1722 = vmatpush3.msra.mxu0 %v38_v43 }
 0x541   :  { %1723 = vmatprep.subr.mxu0 %v1779_v10 }
 0x542   :  { %1724 = vmatpush3.msra.mxu0 %v37_v44 }
 0x543   :  { %1725 = vmatprep.subr.mxu0 %v1779_v10 }
 0x544   :  { %1726 = vmatpush3.msra.mxu0 %v36_v47 }
 0x545   :  { %1727 = vmatprep.subr.mxu0 %v1779_v10 }
 0x546   :  { %1728 = vmatpush3.msra.mxu0 %v35_v48 }
 0x547   :  { %1729 = vmatprep.subr.mxu0 %v1779_v10 }
 0x548   :  { %1730 = vmatpush3.msra.mxu0 %v34_v52 }
 0x549   :  { %1731 = vmatprep.subr.mxu0 %v1779_v10 }
 0x54a   :  { %1732 = vmatpush3.msra.mxu0 %v33_v53 }
 0x54b   :  { %1733 = vmatprep.subr.mxu0 %v1779_v10 }
 0x54c   :  { %1734 = vmatpush3.msra.mxu0 %v32_v56 }
 0x54d   :  { %1735 = vmatprep.subr.mxu0 %v1779_v10 }
 0x54e   :  { %1736 = vmatpush3.msra.mxu0 %v31_v57 }
 0x54f   :  { %1737 = vmatprep.subr.mxu0 %v1779_v10 }
 0x550   :  { %1738 = vmatpush3.msra.mxu0 %v30_v60 }
 0x551   :  { %1740 = vmatmul.mubr.f32.vlgmr.msra.gmra.mxu0 %v1202_v61 }
 0x5f1   :  { %v1069_v0 = vpop.f32.mrf.mxu0 }
 0x5f2   :  { %v1076_v22 = vrot.slane %v1069_v0, %v1954_v20  ;;  %v1084_v27 = vrot.slane %v1069_v0, %v1957_v21 }
 0x5f3   :  { %v1694_v1 = vpop.f32.mrf.mxu0 }
 0x5f4   :  { %v1077_v23 = vmul.f32 %v1076_v22, %v2038_v32  ;;  %v1078_v24 = vmul.f32 %v1076_v22, %v2036_v29  ;;  %v1079_v32 = vmul.f32 %v1076_v22, %v2051_v15  ;;  %v1080_v29 = vmul.f32 %v1076_v22, %v2046_v37 }
 0x5f6   :  { %v1085_v30 = vadd.f32 %v1084_v27, %v1077_v23  ;;  %v1086_v31 = vadd.f32 %v1084_v27, %v1078_v24  ;;  %v1087_v16 = vadd.f32 %v1084_v27, %v1079_v32  ;;  %v1088_v11 = vadd.f32 %v1084_v27, %v1080_v29 }
 0x5f8   :  { %v1089_v36 = vmax.f32 %v1085_v30, 0.0  ;;  %v1090_v38 = vmax.f32 %v1086_v31, 0.0  ;;  %v1091_v15 = vmax.f32 %v1087_v16, 0.0  ;;  %v1092_v37 = vmax.f32 %v1088_v11, 0.0 }
 0x5fa   :  { %v1093_v13 = vpack.c.bf16 %v1090_v38, %v1089_v36  ;;  %v1094_v14 = vpack.c.bf16 %v1092_v37, %v1091_v15 }
 0x611   :  { %v1269_v2 = vpop.f32.mrf.mxu0 }
 0x612   :  { %v1273_v6 = vmul.f32 %v1269_v2, %v1269_v2 }
 0x613   :  { %v1741_v50 = vpop.f32.mrf.mxu0 }
 0x614   :  { %v1275_v10 = vrot.slane %v1273_v6, 7 }
 0x616   :  { %v1277_v8 = vsub.f32 %v1269_v2, %v1275_v10 }
 0x618   :  { %v1278_v18 = vadd.f32 1e-05, %v1277_v8 }
 0x61a   :  { %1777 = vrsqrt.f32 %v1278_v18 }
 0x627   :  { %v1778_v25 = vpop.eup %1777 }
 0x628   :  { %v1281_v28 = vrot.slane %v1778_v25, 1 }
 0x62a   :  { %v1283_v9 = vmul.f32 %v1281_v28, %v56_v26 }
 0x62c   :  { %v1284_v34 = vmul.f32 %v1283_v9, %v1269_v2 }
 0x62e   :  { %v1285_v35 = vsub.f32 %v57_v33, %v1284_v34 }
 0x630   :  { %v1287_v39 = vrot.slane %v1285_v35, 7 }
 0x632   :  { %v1289_v12 = vsel %vm183_vm3, %v1283_v9, %v1287_v39 }
 0x633   :  { %1745 = vmatmul.mubr.msk.f32.vlgmr.msra.gmra.mxu1 %vm1290_vm0, %v1289_v12 }
 0x634   :  { %1748 = vmatpush3.bf16.msra.mxu1 %v1771_v63  ;;  %1751 = vmatprep.mubr.msk.bf16.mxu1 %vm152_vm2, %v1093_v13 }
 0x635   :  { %1749 = vmatprep.subr.bf16.mxu1 %v1772_v17 }
 0x638   :  { %1750 = vmatpush3.bf16.msra.mxu1 %v1772_v17 }
 0x63b   :  { %1752 = vmatmul.mubr.msk.bf16.vlgmr.msra.gmra.mxu1 %vm152_vm2, %v1094_v14 }
 0x6f3   :  { %v1360_v19 = vpop.f32.mrf.mxu1 }
 0x6f4   :  { %v1367_v40 = vrot.slane %v1360_v19, %v1954_v20  ;;  %v1375_v42 = vrot.slane %v1360_v19, %v1957_v21 }
 0x6f5   :  { %v1746_v41 = vpop.f32.mrf.mxu1 }
 0x6f6   :  { %v1370_v43 = vmul.f32 %v2071_v3, %v1367_v40  ;;  %v1368_v45 = vmul.f32 %v1367_v40, %v2073_v4  ;;  %v1371_v46 = vmul.f32 %v2075_v5, %v1367_v40  ;;  %v1369_v51 = vmul.f32 %v1367_v40, %v2080_v7 }
 0x6f8   :  { %v1378_v44 = vadd.f32 %v1375_v42, %v1370_v43  ;;  %v1376_v49 = vadd.f32 %v1375_v42, %v1368_v45  ;;  %v1379_v55 = vadd.f32 %v1375_v42, %v1371_v46  ;;  %v1377_v56 = vadd.f32 %v1375_v42, %v1369_v51 }
 0x6fb   :  { %v1753_v47 = vpop.f32.mrf.mxu1 }
 0x6fc   :  { %v1441_v48 = vadd.f32 %v1753_v47, %v1378_v44 }
 0x6fd   :  { %v1432_v52 = vpop.f32.mrf.mxu1 }
 0x6fe   :  { %v1449_v53 = vmax.f32 %v1441_v48, 0.0  ;;  %v1433_v54 = vadd.f32 %v1432_v52, %v1376_v49 }
 0x6ff   :  { %v1754_v20 = vpop.f32.mrf.mxu1 }
 0x700   :  { %1453 = vst [vmem:[%s2215_s8 + $0x10] sm:$0xff] %v1449_v53  ;;  %v1447_v21 = vmax.f32 %v1433_v54, 0.0  ;;  %v1444_v3 = vadd.f32 %v1754_v20, %v1379_v55 }
 0x701   :  { %v1435_v4 = vpop.f32.mrf.mxu1 }
 0x702   :  { %1451 = vst [vmem:[%s2215_s8] sm:$0xff] %v1447_v21  ;;  %v1450_v5 = vmax.f32 %v1444_v3, 0.0  ;;  %v1436_v57 = vadd.f32 %v1435_v4, %v1377_v56 }
 0x704   :  { %1454 = vst [vmem:[%s2215_s8 + $0x18] sm:$0xff] %v1450_v5  ;;  %v1448_v7 = vmax.f32 %v1436_v57, 0.0 }
 0x706   :  { %1452 = vst [vmem:[%s2215_s8 + $0x8] sm:$0xff] %v1448_v7 }

</bundles_post_ra>
